<compile_context>
chip_gen: v7x
topology: tpu7x:2x2x1
jax: 0.10.0
libtpu: 0.0.40
codegen_flags: <defaults>
</compile_context>

<pallas_src>
import functools

import jax
import jax.numpy as jnp
from jax.experimental import pallas as pl
from jax.experimental.pallas import tpu as pltpu


def _dcn_mixhead_kernel(x_ref, v_ref, c_ref, u_ref, b_ref, g_ref, e_ref, o_ref,
                        *, num_layers, gate_softmax):
    """Whole DCN-mixture stack for one batch tile.

    x_ref : (TB, D)        input tile x_0
    v_ref : (L, D, E*R)    per-layer V, experts packed along lanes
    c_ref : (L, E*R, E*R)  per-layer block-diagonal C
    u_ref : (L, E*R, D)    per-layer U, experts packed along sublanes
    b_ref : (L, 1, D)      per-layer bias
    g_ref : (D, E)         shared gate weights (pre-transposed)
    e_ref : (E, E*R)       constant expert -> expert*rank expansion matrix
    o_ref : (TB, D)        output tile x_L
    """
    x0 = x_ref[...].astype(jnp.float32)          # (TB, D)
    gate_w = g_ref[...].astype(jnp.float32)      # (D, E)
    expand = e_ref[...].astype(jnp.float32)      # (E, ER)

    x_l = x0
    for layer in range(num_layers):              # static, fully unrolled
        v = v_ref[layer].astype(jnp.float32)     # (D, ER)
        c = c_ref[layer].astype(jnp.float32)     # (ER, ER)
        u = u_ref[layer].astype(jnp.float32)     # (ER, D)
        bias = b_ref[layer].astype(jnp.float32)  # (1, D)

        # Gates from x_l.
        gates = jnp.dot(x_l, gate_w, preferred_element_type=jnp.float32)  # (TB, E)
        if gate_softmax:
            gates = jax.nn.softmax(gates, axis=1)
        gates_er = jnp.dot(gates, expand,
                           preferred_element_type=jnp.float32)            # (TB, ER)

        # Batched low-rank mixture: 3 matmuls cover all experts.
        t = jnp.tanh(jnp.dot(x_l, v, preferred_element_type=jnp.float32))  # (TB, ER)
        t = jnp.tanh(jnp.dot(t, c, preferred_element_type=jnp.float32))    # (TB, ER)
        t = t * gates_er                       # gate folded before U-projection
        mix = jnp.dot(t, u, preferred_element_type=jnp.float32)            # (TB, D)

        # x_{l+1} = x0 * (sum_e g_e * (t_e @ U_e) + bias * sum_e g_e) + x_l
        if gate_softmax:
            bias_term = bias                       # softmax gates sum to 1
        else:
            gate_sum = jnp.sum(gates, axis=1, keepdims=True)               # (TB, 1)
            bias_term = bias * gate_sum
        x_l = x0 * (mix + bias_term) + x_l

    o_ref[...] = x_l.astype(o_ref.dtype)


def _pick_batch_tile(B, batch_tile):
    if B <= batch_tile:
        return B
    candidates = [t for t in range(8, batch_tile + 1, 8) if B % t == 0]
    return max(candidates) if candidates else B


def dcn_mixhead_forward(x0, V_all, C_all, U_all, b_all, gates_w,
                        *, gate_softmax=False, batch_tile=512):
    """Pallas DCN_MixHead forward. x0: (B, D) -> (B, D).

    V_all: (L, E, D, R), C_all: (L, E, R, R), U_all: (L, E, R, D),
    b_all: (L, 1, D), gates_w: (D, E)  (torch `gates` param pre-transposed).
    """
    B, D = x0.shape
    L, E, _, R = V_all.shape
    ER = E * R
    assert C_all.shape == (L, E, R, R)
    assert U_all.shape == (L, E, R, D)
    assert b_all.shape == (L, 1, D)
    assert gates_w.shape == (D, E)

    # --- host-side weight packing (layout plumbing, not compute) ---
    V_packed = jnp.transpose(V_all, (0, 2, 1, 3)).reshape(L, D, ER)   # (L, D, ER)
    U_packed = U_all.reshape(L, ER, D)                                # (L, ER, D)
    eye_e = jnp.eye(E, dtype=C_all.dtype)
    C_blk = jnp.einsum('lers,ef->lerfs', C_all, eye_e).reshape(L, ER, ER)
    expand = jnp.repeat(jnp.eye(E, dtype=jnp.float32), R, axis=1)     # (E, ER)

    # --- batch tiling (the only grid axis) ---
    TB = _pick_batch_tile(B, batch_tile)
    assert B % TB == 0, f"batch {B} must be divisible by tile {TB}"
    grid = (B // TB,)

    kernel = functools.partial(_dcn_mixhead_kernel,
                               num_layers=L, gate_softmax=gate_softmax)

    return pl.pallas_call(
        kernel,
        out_shape=jax.ShapeDtypeStruct((B, D), x0.dtype),
        grid_spec=pltpu.PrefetchScalarGridSpec(
            num_scalar_prefetch=0,
            grid=grid,
            in_specs=[
                pl.BlockSpec((TB, D), lambda b: (b, 0)),         # x_0 tile
                pl.BlockSpec((L, D, ER), lambda b: (0, 0, 0)),   # V packed
                pl.BlockSpec((L, ER, ER), lambda b: (0, 0, 0)),  # C block-diag
                pl.BlockSpec((L, ER, D), lambda b: (0, 0, 0)),   # U packed
                pl.BlockSpec((L, 1, D), lambda b: (0, 0, 0)),    # bias
                pl.BlockSpec((D, E), lambda b: (0, 0)),          # gate weights
                pl.BlockSpec((E, ER), lambda b: (0, 0)),         # expand matrix
            ],
            out_specs=pl.BlockSpec((TB, D), lambda b: (b, 0)),
        ),
        compiler_params=pltpu.CompilerParams(
            dimension_semantics=("parallel",)),
    )(x0, V_packed, C_blk, U_packed, b_all, gates_w, expand)


def dcn_mixhead_reference(x0, V_all, C_all, U_all, b_all, gates_w,
                          *, gate_softmax=False):
    """Pure-JAX reference mirroring the PyTorch forward exactly."""
    L = V_all.shape[0]
    x_l = x0
    x0e = x0[:, None, :]                                   # (B, 1, D)
    for l in range(L):
        V, C, U, b = V_all[l], C_all[l], U_all[l], b_all[l]
        E_i = jnp.tanh(jnp.einsum('bd,edr->ber', x_l, V))  # (B, E, R)
        E_i = jnp.tanh(jnp.einsum('ber,ers->bes', E_i, C))
        E_i = jnp.einsum('ber,erd->bed', E_i, U)           # (B, E, D)
        E = x0e * (E_i + b[None, :, :])                    # (B, E, D)
        g = x_l @ gates_w                                  # (B, E)
        if gate_softmax:
            g = jax.nn.softmax(g, axis=1)
        x_l = jnp.einsum('be,bed->bd', g, E) + x_l
    return x_l


def _kaiming_normal(key, shape):
    # torch kaiming_normal_ (fan_in, gain=sqrt(2)): fan_in = prod(shape[1:])
    fan_in = 1
    for s in shape[1:]:
        fan_in *= s
    std = (2.0 / fan_in) ** 0.5
    return std * jax.random.normal(key, shape, dtype=jnp.float32)


if __name__ == "__main__":
    # Small shapes implied by the module: x_0 is (batch, hidden)
    batch, hidden, num_experts, rank, num_layers = 8, 32, 4, 4, 2

    key = jax.random.PRNGKey(0)
    keys = jax.random.split(key, 2 * num_layers + 2)

    x0 = jax.random.normal(keys[0], (batch, hidden), dtype=jnp.float32)

    V_all = jnp.stack([_kaiming_normal(keys[1 + l], (num_experts, hidden, rank))
                       for l in range(num_layers)])                      # (L,E,D,R)
    C_all = jnp.stack([_kaiming_normal(keys[1 + num_layers + l],
                                       (num_experts, rank, rank))
                       for l in range(num_layers)])                      # (L,E,R,R)
    U_all = jnp.stack([_kaiming_normal(jax.random.fold_in(keys[-1], l),
                                       (num_experts, rank, hidden))
                       for l in range(num_layers)])                      # (L,E,R,D)
    b_all = jnp.zeros((num_layers, 1, hidden), dtype=jnp.float32)        # zeros init
    # torch gates param: (E, D, 1); store pre-transposed as (D, E)
    gates_param = _kaiming_normal(keys[-2], (num_experts, hidden, 1))
    gates_w = jnp.transpose(gates_param[:, :, 0], (1, 0))                # (D, E)

    for softmax in (False, True):   # gate_act='identity' (default) and 'softmax'
        out = dcn_mixhead_forward(x0, V_all, C_all, U_all, b_all, gates_w,
                                  gate_softmax=softmax)
        out = jax.block_until_ready(out)
        ref = dcn_mixhead_reference(x0, V_all, C_all, U_all, b_all, gates_w,
                                    gate_softmax=softmax)
        if not jnp.allclose(out, ref, atol=1e-4, rtol=1e-4):
            raise AssertionError(
                f"Pallas kernel mismatch vs JAX reference (softmax={softmax})")

    print("KERNEL_OK")
</pallas_src>

<mosaic_0001>
module attributes {stable_mosaic.version = 11 : i64} {
  func.func @_dcn_mixhead_kernel(%arg0: i32, %arg1: memref<8x32xf32, #tpu.memory_space<vmem>>, %arg2: memref<2x32x16xf32, #tpu.memory_space<vmem>>, %arg3: memref<2x16x16xf32, #tpu.memory_space<vmem>>, %arg4: memref<2x16x32xf32, #tpu.memory_space<vmem>>, %arg5: memref<2x1x32xf32, #tpu.memory_space<vmem>>, %arg6: memref<32x4xf32, #tpu.memory_space<vmem>>, %arg7: memref<4x16xf32, #tpu.memory_space<vmem>>, %arg8: memref<8x32xf32, #tpu.memory_space<vmem>>) attributes {dimension_semantics = [#tpu.dimension_semantics<parallel>], iteration_bounds = array<i64: 1>, scalar_prefetch = 0 : i64, scratch_operands = 0 : i64, tpu.core_type = #tpu.core_type<tc>, window_params = [{transform_indices = @transform_0, window_bounds = array<i64: 8, 32>}, {pipeline_mode = #tpu.pipeline_mode<synchronous>, transform_indices = @transform_1, window_bounds = array<i64: 2, 32, 16>}, {pipeline_mode = #tpu.pipeline_mode<synchronous>, transform_indices = @transform_2, window_bounds = array<i64: 2, 16, 16>}, {pipeline_mode = #tpu.pipeline_mode<synchronous>, transform_indices = @transform_3, window_bounds = array<i64: 2, 16, 32>}, {pipeline_mode = #tpu.pipeline_mode<synchronous>, transform_indices = @transform_4, window_bounds = array<i64: 2, 1, 32>}, {pipeline_mode = #tpu.pipeline_mode<synchronous>, transform_indices = @transform_5, window_bounds = array<i64: 32, 4>}, {pipeline_mode = #tpu.pipeline_mode<synchronous>, transform_indices = @transform_6, window_bounds = array<i64: 4, 16>}, {transform_indices = @transform_7, window_bounds = array<i64: 8, 32>}]} {
    %c0 = arith.constant 0 : index
    %c0_0 = arith.constant 0 : index
    %0 = vector.load %arg1[%c0, %c0_0] : memref<8x32xf32, #tpu.memory_space<vmem>>, vector<8x32xf32>
    %c0_1 = arith.constant 0 : index
    %c0_2 = arith.constant 0 : index
    %1 = vector.load %arg6[%c0_1, %c0_2] : memref<32x4xf32, #tpu.memory_space<vmem>>, vector<32x4xf32>
    %c0_3 = arith.constant 0 : index
    %c0_4 = arith.constant 0 : index
    %2 = vector.load %arg7[%c0_3, %c0_4] : memref<4x16xf32, #tpu.memory_space<vmem>>, vector<4x16xf32>
    %c0_5 = arith.constant 0 : index
    %c0_6 = arith.constant 0 : index
    %c0_7 = arith.constant 0 : index
    %3 = vector.load %arg2[%c0_5, %c0_6, %c0_7] : memref<2x32x16xf32, #tpu.memory_space<vmem>>, vector<1x32x16xf32>
    %4 = vector.shape_cast %3 : vector<1x32x16xf32> to vector<32x16xf32>
    %c0_8 = arith.constant 0 : index
    %c0_9 = arith.constant 0 : index
    %c0_10 = arith.constant 0 : index
    %5 = vector.load %arg3[%c0_8, %c0_9, %c0_10] : memref<2x16x16xf32, #tpu.memory_space<vmem>>, vector<1x16x16xf32>
    %6 = vector.shape_cast %5 : vector<1x16x16xf32> to vector<16x16xf32>
    %c0_11 = arith.constant 0 : index
    %c0_12 = arith.constant 0 : index
    %c0_13 = arith.constant 0 : index
    %7 = vector.load %arg4[%c0_11, %c0_12, %c0_13] : memref<2x16x32xf32, #tpu.memory_space<vmem>>, vector<1x16x32xf32>
    %8 = vector.shape_cast %7 : vector<1x16x32xf32> to vector<16x32xf32>
    %c0_14 = arith.constant 0 : index
    %c0_15 = arith.constant 0 : index
    %c0_16 = arith.constant 0 : index
    %9 = vector.load %arg5[%c0_14, %c0_15, %c0_16] : memref<2x1x32xf32, #tpu.memory_space<vmem>>, vector<1x1x32xf32>
    %10 = vector.shape_cast %9 : vector<1x1x32xf32> to vector<1x32xf32>
    %cst = arith.constant dense<0.000000e+00> : vector<8x4xf32>
    %11 = tpu.matmul %0, %1, %cst {dimension_numbers = #tpu.dot_dimension_numbers<[1], [0], [0], [1], [0, 0, 1, 1], [], []>} : vector<8x32xf32>, vector<32x4xf32>, vector<8x4xf32> -> vector<8x4xf32>
    %cst_17 = arith.constant dense<0.000000e+00> : vector<8x16xf32>
    %12 = tpu.matmul %11, %2, %cst_17 {dimension_numbers = #tpu.dot_dimension_numbers<[1], [0], [0], [1], [0, 0, 1, 1], [], []>} : vector<8x4xf32>, vector<4x16xf32>, vector<8x16xf32> -> vector<8x16xf32>
    %cst_18 = arith.constant dense<0.000000e+00> : vector<8x16xf32>
    %13 = tpu.matmul %0, %4, %cst_18 {dimension_numbers = #tpu.dot_dimension_numbers<[1], [0], [0], [1], [0, 0, 1, 1], [], []>} : vector<8x32xf32>, vector<32x16xf32>, vector<8x16xf32> -> vector<8x16xf32>
    %14 = math.tanh %13 : vector<8x16xf32>
    %cst_19 = arith.constant dense<0.000000e+00> : vector<8x16xf32>
    %15 = tpu.matmul %14, %6, %cst_19 {dimension_numbers = #tpu.dot_dimension_numbers<[1], [0], [0], [1], [0, 0, 1, 1], [], []>} : vector<8x16xf32>, vector<16x16xf32>, vector<8x16xf32> -> vector<8x16xf32>
    %16 = math.tanh %15 : vector<8x16xf32>
    %17 = arith.mulf %16, %12 : vector<8x16xf32>
    %cst_20 = arith.constant dense<0.000000e+00> : vector<8x32xf32>
    %18 = tpu.matmul %17, %8, %cst_20 {dimension_numbers = #tpu.dot_dimension_numbers<[1], [0], [0], [1], [0, 0, 1, 1], [], []>} : vector<8x16xf32>, vector<16x32xf32>, vector<8x32xf32> -> vector<8x32xf32>
    %cst_21 = arith.constant dense<0.000000e+00> : vector<8xf32>
    %19 = vector.multi_reduction <add>, %11, %cst_21 [1] : vector<8x4xf32> to vector<8xf32>
    %20 = vector.shape_cast %19 : vector<8xf32> to vector<8x1xf32>
    %21 = vector.broadcast %10 : vector<1x32xf32> to vector<8x32xf32>
    %22 = vector.broadcast %20 : vector<8x1xf32> to vector<8x32xf32>
    %23 = arith.mulf %21, %22 : vector<8x32xf32>
    %24 = arith.addf %18, %23 : vector<8x32xf32>
    %25 = arith.mulf %0, %24 : vector<8x32xf32>
    %26 = arith.addf %25, %0 : vector<8x32xf32>
    %c1 = arith.constant 1 : index
    %c0_22 = arith.constant 0 : index
    %c0_23 = arith.constant 0 : index
    %27 = vector.load %arg2[%c1, %c0_22, %c0_23] : memref<2x32x16xf32, #tpu.memory_space<vmem>>, vector<1x32x16xf32>
    %28 = vector.shape_cast %27 : vector<1x32x16xf32> to vector<32x16xf32>
    %c1_24 = arith.constant 1 : index
    %c0_25 = arith.constant 0 : index
    %c0_26 = arith.constant 0 : index
    %29 = vector.load %arg3[%c1_24, %c0_25, %c0_26] : memref<2x16x16xf32, #tpu.memory_space<vmem>>, vector<1x16x16xf32>
    %30 = vector.shape_cast %29 : vector<1x16x16xf32> to vector<16x16xf32>
    %c1_27 = arith.constant 1 : index
    %c0_28 = arith.constant 0 : index
    %c0_29 = arith.constant 0 : index
    %31 = vector.load %arg4[%c1_27, %c0_28, %c0_29] : memref<2x16x32xf32, #tpu.memory_space<vmem>>, vector<1x16x32xf32>
    %32 = vector.shape_cast %31 : vector<1x16x32xf32> to vector<16x32xf32>
    %c1_30 = arith.constant 1 : index
    %c0_31 = arith.constant 0 : index
    %c0_32 = arith.constant 0 : index
    %33 = vector.load %arg5[%c1_30, %c0_31, %c0_32] : memref<2x1x32xf32, #tpu.memory_space<vmem>>, vector<1x1x32xf32>
    %34 = vector.shape_cast %33 : vector<1x1x32xf32> to vector<1x32xf32>
    %cst_33 = arith.constant dense<0.000000e+00> : vector<8x4xf32>
    %35 = tpu.matmul %26, %1, %cst_33 {dimension_numbers = #tpu.dot_dimension_numbers<[1], [0], [0], [1], [0, 0, 1, 1], [], []>} : vector<8x32xf32>, vector<32x4xf32>, vector<8x4xf32> -> vector<8x4xf32>
    %cst_34 = arith.constant dense<0.000000e+00> : vector<8x16xf32>
    %36 = tpu.matmul %35, %2, %cst_34 {dimension_numbers = #tpu.dot_dimension_numbers<[1], [0], [0], [1], [0, 0, 1, 1], [], []>} : vector<8x4xf32>, vector<4x16xf32>, vector<8x16xf32> -> vector<8x16xf32>
    %cst_35 = arith.constant dense<0.000000e+00> : vector<8x16xf32>
    %37 = tpu.matmul %26, %28, %cst_35 {dimension_numbers = #tpu.dot_dimension_numbers<[1], [0], [0], [1], [0, 0, 1, 1], [], []>} : vector<8x32xf32>, vector<32x16xf32>, vector<8x16xf32> -> vector<8x16xf32>
    %38 = math.tanh %37 : vector<8x16xf32>
    %cst_36 = arith.constant dense<0.000000e+00> : vector<8x16xf32>
    %39 = tpu.matmul %38, %30, %cst_36 {dimension_numbers = #tpu.dot_dimension_numbers<[1], [0], [0], [1], [0, 0, 1, 1], [], []>} : vector<8x16xf32>, vector<16x16xf32>, vector<8x16xf32> -> vector<8x16xf32>
    %40 = math.tanh %39 : vector<8x16xf32>
    %41 = arith.mulf %40, %36 : vector<8x16xf32>
    %cst_37 = arith.constant dense<0.000000e+00> : vector<8x32xf32>
    %42 = tpu.matmul %41, %32, %cst_37 {dimension_numbers = #tpu.dot_dimension_numbers<[1], [0], [0], [1], [0, 0, 1, 1], [], []>} : vector<8x16xf32>, vector<16x32xf32>, vector<8x32xf32> -> vector<8x32xf32>
    %cst_38 = arith.constant dense<0.000000e+00> : vector<8xf32>
    %43 = vector.multi_reduction <add>, %35, %cst_38 [1] : vector<8x4xf32> to vector<8xf32>
    %44 = vector.shape_cast %43 : vector<8xf32> to vector<8x1xf32>
    %45 = vector.broadcast %34 : vector<1x32xf32> to vector<8x32xf32>
    %46 = vector.broadcast %44 : vector<8x1xf32> to vector<8x32xf32>
    %47 = arith.mulf %45, %46 : vector<8x32xf32>
    %48 = arith.addf %42, %47 : vector<8x32xf32>
    %49 = arith.mulf %0, %48 : vector<8x32xf32>
    %50 = arith.addf %49, %26 : vector<8x32xf32>
    %c0_39 = arith.constant 0 : index
    %c0_40 = arith.constant 0 : index
    %51 = vector.load %arg8[%c0_39, %c0_40] : memref<8x32xf32, #tpu.memory_space<vmem>>, vector<8x32xf32>
    tpu.vector_store %arg8[%c0_39, %c0_40], %50 {strides = array<i32>} : memref<8x32xf32, #tpu.memory_space<vmem>>, vector<8x32xf32>,
    return
  }
  func.func @transform_0(%arg0: i32) -> (i32, i32) {
    %c0_i32 = arith.constant 0 : i32
    %c0_i32_0 = arith.constant 0 : i32
    return %arg0, %c0_i32 : i32, i32
  }
  func.func @transform_1(%arg0: i32) -> (i32, i32, i32) {
    %c0_i32 = arith.constant 0 : i32
    %c0_i32_0 = arith.constant 0 : i32
    %c0_i32_1 = arith.constant 0 : i32
    %c0_i32_2 = arith.constant 0 : i32
    return %c0_i32, %c0_i32_0, %c0_i32_1 : i32, i32, i32
  }
  func.func @transform_2(%arg0: i32) -> (i32, i32, i32) {
    %c0_i32 = arith.constant 0 : i32
    %c0_i32_0 = arith.constant 0 : i32
    %c0_i32_1 = arith.constant 0 : i32
    %c0_i32_2 = arith.constant 0 : i32
    return %c0_i32, %c0_i32_0, %c0_i32_1 : i32, i32, i32
  }
  func.func @transform_3(%arg0: i32) -> (i32, i32, i32) {
    %c0_i32 = arith.constant 0 : i32
    %c0_i32_0 = arith.constant 0 : i32
    %c0_i32_1 = arith.constant 0 : i32
    %c0_i32_2 = arith.constant 0 : i32
    return %c0_i32, %c0_i32_0, %c0_i32_1 : i32, i32, i32
  }
  func.func @transform_4(%arg0: i32) -> (i32, i32, i32) {
    %c0_i32 = arith.constant 0 : i32
    %c0_i32_0 = arith.constant 0 : i32
    %c0_i32_1 = arith.constant 0 : i32
    %c0_i32_2 = arith.constant 0 : i32
    return %c0_i32, %c0_i32_0, %c0_i32_1 : i32, i32, i32
  }
  func.func @transform_5(%arg0: i32) -> (i32, i32) {
    %c0_i32 = arith.constant 0 : i32
    %c0_i32_0 = arith.constant 0 : i32
    %c0_i32_1 = arith.constant 0 : i32
    return %c0_i32, %c0_i32_0 : i32, i32
  }
  func.func @transform_6(%arg0: i32) -> (i32, i32) {
    %c0_i32 = arith.constant 0 : i32
    %c0_i32_0 = arith.constant 0 : i32
    %c0_i32_1 = arith.constant 0 : i32
    return %c0_i32, %c0_i32_0 : i32, i32
  }
  func.func @transform_7(%arg0: i32) -> (i32, i32) {
    %c0_i32 = arith.constant 0 : i32
    %c0_i32_0 = arith.constant 0 : i32
    return %arg0, %c0_i32 : i32, i32
  }
}

</mosaic_0001>

<bundles_post_ra>
// kernel: tpu_custom_call.1
= control target key start
LH: loop header
LB: loop body
LE: loop exit
PB: predicated region body
PF: predicated region fallthrough
CT: control target
= control target key end

     0   :  { %v1044_v3 = vmov 0.0|0.0   ;;  %vm1045_vm0 = vmmov 0   ;;  %v1046_v6 = vmov 0.0   ;;  %vm120_vm1 = vcmask 1043456   ;;  %s1232_s0 = inlined_call_operand.vmem [shape: f32[8,32], index: 0, kind: input, shape index: {}]   ;;  %s1233_s1 = inlined_call_operand.vmem [shape: f32[2,32,16], index: 1, kind: input, shape index: {}]   ;;  %s1234_s2 = inlined_call_operand.vmem [shape: f32[2,16,16], index: 2, kind: input, shape index: {}]   ;;  %s1235_s3 = inlined_call_operand.vmem [shape: f32[2,16,32], index: 3, kind: input, shape index: {}]   ;;  %s1236_s4 = inlined_call_operand.vmem [shape: f32[2,1,32], index: 4, kind: input, shape index: {}]   ;;  %s1237_s5 = inlined_call_operand.vmem [shape: f32[32,4], index: 5, kind: input, shape index: {}]   ;;  %s1238_s6 = inlined_call_operand.vmem [shape: f32[4,16], index: 6, kind: input, shape index: {}]   ;;  %s1239_s7 = inlined_call_operand.hbm [shape: f32[8,32], index: 7, kind: output, shape index: {}]  }
   0x1   :  { %v28_v0 = vld [vmem:[%s1237_s5] sm:$0xff]  ;;  %v29_v1 = vld [vmem:[%s1237_s5 + $0x8] sm:$0xff]  ;;  %v30_v2 = vld [vmem:[%s1237_s5 + $0x10] sm:$0xff]  ;;  %972 = vmatprep.subr.bf16.mxu0 %v1044_v3  ;;  %898 = vmatprep.mubr.msk.f32.mxu0 %vm1045_vm0, %v1046_v6 }
   0x2   :  { %v973_v4 = vpack.c.bf16 %v29_v1, %v28_v0  ;;  %v31_v5 = vld [vmem:[%s1237_s5 + $0x18] sm:$0xff]  ;;  %v1106_v7 = vld [vmem:[%s1238_s6] sm:$0xf]  ;;  %901 = vmatprep.subr.mxu1 %v1046_v6  ;;  %903 = vmatprep.mubr.msk.f32.mxu1 %vm1045_vm0, %v1046_v6 }
   0x3   :  { %12 = vsyncpa [#allocation3], 0  ;;  %v976_v8 = vpack.c.bf16 %v31_v5, %v30_v2  ;;  %902 = vmatpush3.msk.msra.mxu1 %vm120_vm1, %v1106_v7  ;;  %v1118_v9 = vld [vmem:[%s1232_s0] sm:$0xff]  ;;  %vm42_vm2 = vcmask 261120   ;;  %v34_v11 = vld [vmem:[%s1233_s1 + $0x8] sm:$0xff]  ;;  %vm116_vm3 = vcmask 31744  }
   0x4   :  { %974 = vmatpush3.bf16.msra.mxu0 %v973_v4  ;;  %978 = vmatprep.subr.bf16.mxu1 %v1044_v3  ;;  %v33_v10 = vld [vmem:[%s1233_s1] sm:$0xff]  ;;  %v35_v13 = vld [vmem:[%s1233_s1 + $0x10] sm:$0xff]  ;;  %v36_v14 = vld [vmem:[%s1233_s1 + $0x18] sm:$0xff]  ;;  %vm265_vm4 = vcmask 130048   ;;  %s1047_s18 = smov [#allocation2]  }
   0x5   :  { %975 = vmatprep.subr.bf16.mxu0 %v1044_v3  ;;  %v979_v12 = vpack.c.bf16 %v34_v11, %v33_v10  ;;  %v982_v18 = vpack.c.bf16 %v36_v14, %v35_v13  ;;  %v37_v19 = vld [vmem:[%s1234_s2] sm:$0xff]  ;;  %v38_v20 = vld [vmem:[%s1234_s2 + $0x8] sm:$0xff]  ;;  %v840_v45 = vld [vmem:[%s1233_s1 + $0x30] sm:$0xff] }
   0x6   :  { %v985_v21 = vpack.c.bf16 %v38_v20, %v37_v19  ;;  %v39_v27 = vld [vmem:[%s1235_s3] sm:$0xff]  ;;  %v40_v28 = vld [vmem:[%s1235_s3 + $0x8] sm:$0xff]  ;;  %v841_v46 = vld [vmem:[%s1233_s1 + $0x38] sm:$0xff] }
   0x7   :  { %v988_v29 = vpack.c.bf16 %v40_v28, %v39_v27  ;;  %v836_v34 = vld [vmem:[%s1236_s4] ss:$0 sm:$0xff]  ;;  %v839_v43 = vld [vmem:[%s1233_s1 + $0x28] sm:$0xff]  ;;  %v1000_v50 = vpack.c.bf16 %v841_v46, %v840_v45  ;;  %v842_v51 = vld [vmem:[%s1234_s2 + $0x10] sm:$0xff] }
   0x8   :  { %977 = vmatpush3.bf16.msra.mxu0 %v976_v8  ;;  %v838_v42 = vld [vmem:[%s1233_s1 + $0x20] sm:$0xff]  ;;  %v843_v52 = vld [vmem:[%s1234_s2 + $0x18] sm:$0xff]  ;;  %v844_v59 = vld [vmem:[%s1235_s3 + $0x10] sm:$0xff] }
   0x9   :  { %984 = vmatprep.subr.bf16.mxu0 %v1044_v3  ;;  %v997_v44 = vpack.c.bf16 %v839_v43, %v838_v42  ;;  %v1003_v53 = vpack.c.bf16 %v843_v52, %v842_v51  ;;  %v845_v60 = vld [vmem:[%s1235_s3 + $0x18] sm:$0xff]  ;;  %v852_v2 = vld [vmem:[%s1236_s4 + $0x1] ss:$0 sm:$0xff]  ;;  %s823_s3 = sshll.u32 %s1047_s18, 4  ;;  %s824_s3 = int_to_ptr.vmem [resolvable:$true] %s823_s3 }
   0xa   :  { %v1006_v61 = vpack.c.bf16 %v845_v60, %v844_v59  ;;  %s1020_s19 = scalar_lea.vmem %s824_s3, 128  ;;  %p1025_p1 = scmp.lt.s32.totalorder %s824_s3, %s824_s3 }
   0xb   :  { %899 = vmatmul.mubr.msk.f32.vlgmr.msra.gmra.mrb[0].mxu0 %vm42_vm2, %v1118_v9  ;;  %p1021_p0 = scmp.ne.s32.totalorder %s824_s3, %s1020_s19  ;;  %p1026_p2 = scmp.lt.s32.totalorder %s1020_s19, %s1020_s19 }
   0xc   :  { %921 = vmatprep.mubr.msk.f32.mxu0 %vm1045_vm0, %v1046_v6  ;;  %986 = vmatpush3.bf16.msra.mxu0 %v985_v21 }
   0xd   :  { %990 = vmatprep.subr.bf16.mxu0 %v1044_v3  ;;  %p1027_p3 = por %p1026_p2, %p1025_p1 }
   0xf   :  { %p1028_p4 = pnand %p1027_p3, %p1021_p0 }
  0xde   :  { %v112_v15 = vpop.f32.mrb[0].mxu0 }
  0xdf   :  { %v900_v16 = vpop.f32.mrb[1].mxu0  ;;  %904 = vmatmul.mubr.msk.f32.vlgmr.msra.gmra.mrb[0].mxu1 %vm116_vm3, %v112_v15  ;;  %v341_v17 = vsel %vm116_vm3, %v112_v15, 0.0 }
  0xe0   :  { %980 = vmatpush3.bf16.msra.mxu1 %v979_v12  ;;  %342 = vadd.xlane.f32.xlu0 %v341_v17 }
  0xe1   :  { %981 = vmatprep.subr.bf16.mxu1 %v1044_v3  ;;  %914 = vmatprep.mubr.msk.f32.mxu1 %vm1045_vm0, %v1046_v6 }
  0xe4   :  { %983 = vmatpush3.bf16.msra.mxu1 %v982_v18 }
  0xe5   :  { %987 = vmatprep.subr.bf16.mxu1 %v1044_v3 }
  0xe7   :  { %915 = vmatmul.mubr.msk.f32.vlgmr.msra.gmra.mrb[2].mxu1 %vm42_vm2, %v1118_v9 }
  0xe8   :  { %928 = vmatprep.mubr.msk.f32.mxu1 %vm1045_vm0, %v1046_v6  ;;  %989 = vmatpush3.bf16.msra.mxu1 %v988_v29 }
  0xe9   :  { %942 = vmatprep.subr.mxu1 %v1046_v6 }
 0x16d   :  { %v343_v35 = vpop.xlane.xlu0 %342 }
 0x16e   :  { %v350_v36 = vmul.f32 %v836_v34, %v343_v35 }
 0x1b2   :  { %v190_v22 = vpop.f32.mrb[0].mxu1 }
 0x1b3   :  { %v905_v23 = vpop.f32.mrb[1].mxu1 }
 0x1ba   :  { %v260_v24 = vpop.f32.mrb[2].mxu1 }
 0x1bb   :  { %1012 = vtanh.f32 %v260_v24  ;;  %v916_v25 = vpop.f32.mrb[3].mxu1 }
 0x1c5   :  { %v1013_v26 = vpop.eup %1012 }
 0x1c6   :  { %922 = vmatmul.mubr.msk.f32.vlgmr.msra.gmra.mrb[2].mxu0 %vm265_vm4, %v1013_v26 }
 0x1c7   :  { %992 = vmatpush3.bf16.msra.mxu0 %v973_v4  ;;  %939 = vmatprep.mubr.msk.f32.mxu0 %vm1045_vm0, %v1046_v6 }
 0x1c8   :  { %993 = vmatprep.subr.bf16.mxu0 %v1044_v3 }
 0x1cb   :  { %995 = vmatpush3.bf16.msra.mxu0 %v976_v8 }
 0x1cc   :  { %1002 = vmatprep.subr.bf16.mxu0 %v1044_v3 }
 0x299   :  { %v335_v30 = vpop.f32.mrb[2].mxu0 }
 0x29a   :  { %1014 = vtanh.f32 %v335_v30  ;;  %v923_v31 = vpop.f32.mrb[3].mxu0 }
 0x2a4   :  { %v1015_v32 = vpop.eup %1014 }
 0x2a5   :  { %v340_v33 = vmul.f32 %v1015_v32, %v190_v22 }
 0x2a7   :  { %929 = vmatmul.mubr.msk.f32.vlgmr.msra.gmra.mrb[4].mxu1 %vm265_vm4, %v340_v33 }
 0x2a8   :  { %943 = vmatpush3.msk.msra.mxu1 %vm120_vm1, %v1106_v7  ;;  %944 = vmatprep.mubr.msk.f32.mxu1 %vm1045_vm0, %v1046_v6 }
 0x2a9   :  { %996 = vmatprep.subr.bf16.mxu1 %v1044_v3 }
 0x37a   :  { %v420_v37 = vpop.f32.mrb[4].mxu1 }
 0x37b   :  { %v421_v38 = vadd.f32 %v420_v37, %v350_v36  ;;  %v930_v39 = vpop.f32.mrb[5].mxu1 }
 0x37d   :  { %v424_v40 = vmul.f32 %v421_v38, %v1118_v9 }
 0x37f   :  { %v425_v41 = vadd.f32 %v424_v40, %v1118_v9 }
 0x381   :  { %940 = vmatmul.mubr.msk.f32.vlgmr.msra.gmra.mrb[4].mxu0 %vm42_vm2, %v425_v41 }
 0x382   :  { %962 = vmatprep.mubr.msk.f32.mxu0 %vm1045_vm0, %v1046_v6  ;;  %1004 = vmatpush3.bf16.msra.mxu0 %v1003_v53 }
 0x383   :  { %1005 = vmatprep.subr.bf16.mxu0 %v1044_v3 }
 0x454   :  { %v508_v47 = vpop.f32.mrb[4].mxu0 }
 0x455   :  { %v941_v48 = vpop.f32.mrb[5].mxu0  ;;  %945 = vmatmul.mubr.msk.f32.vlgmr.msra.gmra.mrb[6].mxu1 %vm116_vm3, %v508_v47  ;;  %v731_v49 = vsel %vm116_vm3, %v508_v47, 0.0 }
 0x456   :  { %998 = vmatpush3.bf16.msra.mxu1 %v997_v44  ;;  %732 = vadd.xlane.f32.xlu0 %v731_v49 }
 0x457   :  { %999 = vmatprep.subr.bf16.mxu1 %v1044_v3  ;;  %955 = vmatprep.mubr.msk.f32.mxu1 %vm1045_vm0, %v1046_v6 }
 0x45a   :  { %1001 = vmatpush3.bf16.msra.mxu1 %v1000_v50 }
 0x45d   :  { %956 = vmatmul.mubr.msk.f32.vlgmr.msra.gmra.mrb[8].mxu1 %vm42_vm2, %v425_v41 }
 0x4e3   :  { %v733_v3 = vpop.xlane.xlu0 %732 }
 0x4e4   :  { %v740_v4 = vmul.f32 %v852_v2, %v733_v3 }
 0x528   :  { %v581_v54 = vpop.f32.mrb[6].mxu1 }
 0x529   :  { %v946_v55 = vpop.f32.mrb[7].mxu1 }
 0x530   :  { %v651_v56 = vpop.f32.mrb[8].mxu1 }
 0x531   :  { %1016 = vtanh.f32 %v651_v56  ;;  %v957_v57 = vpop.f32.mrb[9].mxu1 }
 0x53b   :  { %v1017_v58 = vpop.eup %1016 }
 0x53c   :  { %963 = vmatmul.mubr.msk.f32.vlgmr.msra.gmra.mrb[6].mxu0 %vm265_vm4, %v1017_v58 }
 0x53d   :  { %969 = vmatprep.mubr.msk.f32.mxu0 %vm1045_vm0, %v1046_v6  ;;  %1007 = vmatpush3.bf16.msra.mxu0 %v1006_v61 }
 0x60f   :  { %v725_v62 = vpop.f32.mrb[6].mxu0 }
 0x610   :  { %1018 = vtanh.f32 %v725_v62  ;;  %v964_v63 = vpop.f32.mrb[7].mxu0 }
 0x61a   :  { %v1019_v0 = vpop.eup %1018 }
 0x61b   :  { %v730_v1 = vmul.f32 %v1019_v0, %v581_v54 }
 0x61d   :  { %970 = vmatmul.mubr.msk.f32.vlgmr.msra.gmra.mrb[8].mxu0 %vm265_vm4, %v730_v1 }
 0x6f0   :  { %v810_v5 = vpop.f32.mrb[8].mxu0 }
 0x6f1   :  { %v811_v6 = vadd.f32 %v810_v5, %v740_v4  ;;  %v971_v7 = vpop.f32.mrb[9].mxu0 }
 0x6f3   :  { %v814_v8 = vmul.f32 %v811_v6, %v1118_v9 }
 0x6f5   :  { %v815_v10 = vadd.f32 %v814_v8, %v425_v41 }
 0x6f7   :  { %816 = vst.msk [vmem:[#allocation2] sm:$0xff] %vm42_vm2, %v815_v10 }
 0x6f8   :  { %1031 = shalt.err (!%p1028_p4)
}
 0x6f9   :  { %s1032_s21 = scalar_lea.hbm %s1239_s7, 128 }
 0x6fa   :  { %p1033_p5 = scmp.ne.s32.totalorder %s1239_s7, %s1032_s21  ;;  %p1036_p6 = scmp.lt.u32.totalorder %s1032_s21, %s1239_s7 }
 0x6fc   :  { %p1038_p7 = pnand %p1036_p6, %p1033_p5 }
 0x6fe   :  { %1041 = shalt.err (!%p1038_p7)
}
 0x6ff   :  { %826 = dma.vmem_to_hbm [thread:$0]  %s824_s3, 128, %s1239_s7, [#allocation3]  }
 0x700   :  { %1042 = dma.done.wait [#allocation3], 128  }
 0x701   :  { %1043 = vsyncadd [#allocation3], 4294967168 }
 0x702   :  { %830 = vsyncpa [#allocation3], 1 }

</bundles_post_ra>
